<compile_context>
chip_gen: v7x
topology: tpu7x:2x2x1
jax: 0.10.0
libtpu: 0.0.40
codegen_flags: <defaults>
</compile_context>

<pallas_src>
import jax
import jax.numpy as jnp
from jax.experimental import pallas as pl
from jax.experimental.pallas import tpu as pltpu

MIB = 1024 * 1024

# Process-wide memo: once a lane-dense weights store fails to lower, stop
# attempting it (fallback column store is always available).
_LANE_DENSE_STATE = {"ok": True}


def _round_up(v, m):
    return -(-v // m) * m


def _tpu_generation():
    try:
        kind = jax.devices()[0].device_kind.lower()
    except Exception:
        return "unknown"
    if "v5 lite" in kind or "v5e" in kind or "v5lite" in kind:
        return "v5e"
    if "v6" in kind:
        return "v6e"
    if "v7" in kind or "7x" in kind:
        return "v7x"
    return "unknown"


# generation -> (x-block byte target, scoped-VMEM cap, min grid steps)
_GEN_CONFIG = {
    "v5e":     (4 * MIB, 32 * MIB, 1),   # ~820 GB/s: 4 MiB is already ~10 us/step
    "v6e":     (8 * MIB, 64 * MIB, 1),   # 128 MiB VMEM: take bigger tiles
    "v7x":     (8 * MIB, 48 * MIB, 2),   # 3.2 TB/s, 2 TCs, but only 64 MiB VMEM
    "unknown": (4 * MIB, 32 * MIB, 2),
}


def _make_kernel(lane_dense):
    def kernel(x_ref, w_ref, b_ref, att_ref, wts_ref):
        # x_ref:   (tile_rows, D)                    VMEM
        # w_ref:   (D, 1)                            VMEM (grid-invariant weight)
        # b_ref:   (1, 1)                            SMEM (bias, f32 scalar)
        # att_ref: (tile_rows, D)                    VMEM  x * sigmoid(x @ w + b)
        # wts_ref: (1, tile_rows) or (tile_rows, 1)  VMEM  sigmoid(x @ w + b)
        x = x_ref[...]

        # N=1 matmul on the otherwise-idle MXU; f32 accumulate, high precision
        # so f32 inputs track a full-precision reference.  No (T, D) f32
        # temporary is materialized.
        logits = jnp.dot(x, w_ref[...],
                         preferred_element_type=jnp.float32,
                         precision=jax.lax.Precision.HIGHEST)        # (T, 1) f32
        wts = jax.nn.sigmoid(logits + b_ref[0, 0])                   # (T, 1) f32

        # Gating multiply stays in the input dtype (no f32 upcast of the tile).
        att_ref[...] = (x * wts.astype(x.dtype)).astype(att_ref.dtype)

        if lane_dense:
            # sublane -> lane relayout so the weights store is an unmasked,
            # lane-dense row instead of T/8 masked single-lane stores.
            wts_ref[...] = jnp.transpose(wts, (1, 0)).astype(wts_ref.dtype)
        else:
            wts_ref[...] = wts.astype(wts_ref.dtype)
    return kernel


def _pick_tile_rows(rows, d_pad, itemsize, row_align, target_block_bytes,
                    vmem_cap_bytes, min_grid, max_tile_rows=32768):
    """Row tile: x block ~target bytes (lane-padded), working set under the cap."""
    row_x_bytes = d_pad * itemsize                       # lane-padded VMEM bytes/row
    # Working set per row: x + attended double-buffered + worst-case (column
    # layout) weights block double-buffered.
    row_ws_bytes = (4 * d_pad + 2 * 128) * itemsize

    tr = target_block_bytes // max(1, row_x_bytes)
    tr = min(tr, (vmem_cap_bytes - 2 * MIB) // row_ws_bytes, max_tile_rows)
    tr = max(row_align, tr - tr % row_align)
    tr = min(tr, _round_up(rows, row_align))             # don't exceed the problem
    if min_grid > 1 and rows > row_align:                # keep all TCs busy (v7x)
        tr = min(tr, _round_up(-(-rows // min_grid), row_align))
    return max(row_align, tr)


def attention_forward(x, w, b, *, tile_rows=None, lane_dense_weights=None):
    """x: (..., D); w: (1, D) nn.Linear weight; b: (1,) nn.Linear bias.

    Returns (attended, weights) = (x * sigmoid(x @ w.T + b), sigmoid(x @ w.T + b))
    with shapes (..., D) and (..., 1), matching the PyTorch module's forward.
    """
    orig_shape = x.shape
    D = orig_shape[-1]
    x2d = x.reshape(-1, D)
    rows = x2d.shape[0]
    itemsize = jnp.dtype(x.dtype).itemsize
    d_pad = _round_up(D, 128)                            # lane padding of the block
    row_align = 8 * max(1, 4 // itemsize)                # f32: 8, bf16: 16, int8: 32

    target_block_bytes, vmem_cap, min_grid = _GEN_CONFIG[_tpu_generation()]

    if tile_rows is None:
        tile_rows = _pick_tile_rows(rows, d_pad, itemsize, row_align,
                                    target_block_bytes, vmem_cap, min_grid)
    tile_rows = max(row_align, (int(tile_rows) // row_align) * row_align)
    num_tiles = pl.cdiv(rows, tile_rows)

    w_col = w.reshape(D, 1).astype(x.dtype)
    b_sc = b.reshape(1, 1).astype(jnp.float32)

    # Scoped VMEM: x + attended double-buffered + (worst case) weights blocks,
    # plus slack for the weight column / bias / pipeline bookkeeping.
    vmem_limit = int(min(vmem_cap,
                         max(8 * MIB,
                             tile_rows * (4 * d_pad + 2 * 128) * itemsize + 2 * MIB)))

    def run(lane_dense):
        if lane_dense:
            wts_shape = jax.ShapeDtypeStruct((num_tiles, tile_rows), x.dtype)
            wts_spec = pl.BlockSpec((1, tile_rows), lambda i: (i, 0))
        else:
            wts_shape = jax.ShapeDtypeStruct((rows, 1), x.dtype)
            wts_spec = pl.BlockSpec((tile_rows, 1), lambda i: (i, 0))
        return pl.pallas_call(
            _make_kernel(lane_dense),
            out_shape=(jax.ShapeDtypeStruct((rows, D), x.dtype), wts_shape),
            grid_spec=pltpu.PrefetchScalarGridSpec(
                num_scalar_prefetch=0,
                grid=(num_tiles,),
                in_specs=[
                    pl.BlockSpec((tile_rows, D), lambda i: (i, 0)),
                    pl.BlockSpec((D, 1), lambda i: (0, 0)),   # grid-invariant weight
                    pl.BlockSpec(memory_space=pltpu.SMEM),    # scalar bias
                ],
                out_specs=[
                    pl.BlockSpec((tile_rows, D), lambda i: (i, 0)),
                    wts_spec,
                ],
            ),
            compiler_params=pltpu.CompilerParams(
                dimension_semantics=("parallel",),
                vmem_limit_bytes=vmem_limit,
            ),
        )(x2d, w_col, b_sc)

    use_dense = lane_dense_weights
    if use_dense is None:
        use_dense = _LANE_DENSE_STATE["ok"]

    attended = weights = None
    if use_dense:
        try:
            attended, weights = run(True)
        except Exception:
            # Relayout / (1, N) out-block not supported on this Mosaic build:
            # fall back to the column store and stop attempting lane-dense.
            _LANE_DENSE_STATE["ok"] = False
            use_dense = False
    if attended is None:
        attended, weights = run(False)

    if use_dense:
        weights = weights.reshape(num_tiles * tile_rows)
        if num_tiles * tile_rows != rows:
            # Tiny (rows,) copy; ~1/D of the attended byte stream.
            weights = weights[:rows]

    return (attended.reshape(orig_shape),
            weights.reshape(orig_shape[:-1] + (1,)))


def _reference(x, w, b):
    # Full-precision VPU reference (no MXU matmul) for the comparison.
    logits = jnp.sum(x * w.reshape(-1), axis=-1, keepdims=True) + b
    wts = jax.nn.sigmoid(logits)
    return x * wts, wts


if __name__ == "__main__":
    key = jax.random.PRNGKey(0)
    kx, kw, kb, kx2 = jax.random.split(key, 4)

    batch, seq, feature_dim = 2, 8, 32
    x = jax.random.normal(kx, (batch, seq, feature_dim), dtype=jnp.float32)

    # Deterministic parameter init (shapes follow nn.Linear(feature_dim, 1)).
    bound = 1.0 / (feature_dim ** 0.5)
    w = jax.random.uniform(kw, (1, feature_dim), jnp.float32, -bound, bound)
    b = jax.random.uniform(kb, (1,), jnp.float32, -bound, bound)

    # Main check.
    attended, weights = attention_forward(x, w, b)
    jax.block_until_ready(attended)
    jax.block_until_ready(weights)
    ref_att, ref_wts = _reference(x, w, b)
    assert attended.shape == x.shape and weights.shape == (batch, seq, 1)
    # Tolerance leaves margin for MXU bf16-pass rounding of the f32 logit dot.
    assert jnp.allclose(weights, ref_wts, atol=5e-3, rtol=5e-3)
    assert jnp.allclose(attended, ref_att, atol=5e-3, rtol=5e-3)

    # Ragged multi-tile check: rows=21 with tile_rows=16 -> 2 grid steps, the
    # second a partial block (exercises unpadded boundary masking, the
    # grid-invariant weight block, and the lane-dense weights tail slice).
    x2 = jax.random.normal(kx2, (3, 7, feature_dim), dtype=jnp.float32)
    att2, wts2 = attention_forward(x2, w, b, tile_rows=16)
    jax.block_until_ready(att2)
    jax.block_until_ready(wts2)
    ref_att2, ref_wts2 = _reference(x2, w, b)
    assert jnp.allclose(wts2, ref_wts2, atol=5e-3, rtol=5e-3)
    assert jnp.allclose(att2, ref_att2, atol=5e-3, rtol=5e-3)

    print("KERNEL_OK")
</pallas_src>

<mosaic_0001>
module attributes {stable_mosaic.version = 11 : i64} {
  func.func @kernel(%arg0: i32, %arg1: memref<8x32xf32, #tpu.memory_space<vmem>>, %arg2: memref<32x1xf32, #tpu.memory_space<vmem>>, %arg3: memref<1x1xf32, #tpu.memory_space<smem>>, %arg4: memref<8x32xf32, #tpu.memory_space<vmem>>, %arg5: memref<8x1xf32, #tpu.memory_space<vmem>>) attributes {dimension_semantics = [#tpu.dimension_semantics<parallel>], iteration_bounds = array<i64: 2>, scalar_prefetch = 0 : i64, scratch_operands = 0 : i64, tpu.core_type = #tpu.core_type<tc>, window_params = [{transform_indices = @transform_0, window_bounds = array<i64: 8, 32>}, {pipeline_mode = #tpu.pipeline_mode<synchronous>, transform_indices = @transform_1, window_bounds = array<i64: 32, 1>}, {transform_indices = @transform_2, window_bounds = array<i64: 1, 1>}, {transform_indices = @transform_3, window_bounds = array<i64: 8, 32>}, {transform_indices = @transform_4, window_bounds = array<i64: 8, 1>}]} {
    %c0 = arith.constant 0 : index
    %c0_0 = arith.constant 0 : index
    %0 = vector.load %arg1[%c0, %c0_0] : memref<8x32xf32, #tpu.memory_space<vmem>>, vector<8x32xf32>
    %c0_1 = arith.constant 0 : index
    %c0_2 = arith.constant 0 : index
    %1 = vector.load %arg2[%c0_1, %c0_2] : memref<32x1xf32, #tpu.memory_space<vmem>>, vector<32x1xf32>
    %cst = arith.constant dense<0.000000e+00> : vector<8x1xf32>
    %2 = tpu.matmul %0, %1, %cst {dimension_numbers = #tpu.dot_dimension_numbers<[1], [0], [0], [1], [0, 0, 1, 1], [], []>, precision = #tpu.contract_precision<fp32>} : vector<8x32xf32>, vector<32x1xf32>, vector<8x1xf32> -> vector<8x1xf32>
    %c0_3 = arith.constant 0 : index
    %c0_4 = arith.constant 0 : index
    %3 = memref.load %arg3[%c0_3, %c0_4] : memref<1x1xf32, #tpu.memory_space<smem>>
    %4 = vector.broadcast %3 : f32 to vector<8x1xf32>
    %5 = arith.addf %2, %4 : vector<8x1xf32>
    %6 = arith.negf %5 : vector<8x1xf32>
    %7 = math.exp %6 : vector<8x1xf32>
    %cst_5 = arith.constant 1.000000e+00 : f32
    %8 = vector.broadcast %cst_5 : f32 to vector<8x1xf32>
    %9 = arith.addf %8, %7 : vector<8x1xf32>
    %10 = arith.divf %8, %9 : vector<8x1xf32>
    %11 = vector.broadcast %10 : vector<8x1xf32> to vector<8x32xf32>
    %12 = arith.mulf %0, %11 : vector<8x32xf32>
    %c0_6 = arith.constant 0 : index
    %c0_7 = arith.constant 0 : index
    %13 = vector.load %arg4[%c0_6, %c0_7] : memref<8x32xf32, #tpu.memory_space<vmem>>, vector<8x32xf32>
    tpu.vector_store %arg4[%c0_6, %c0_7], %12 {strides = array<i32>} : memref<8x32xf32, #tpu.memory_space<vmem>>, vector<8x32xf32>,
    %c0_8 = arith.constant 0 : index
    %c0_9 = arith.constant 0 : index
    %14 = vector.load %arg5[%c0_8, %c0_9] : memref<8x1xf32, #tpu.memory_space<vmem>>, vector<8x1xf32>
    tpu.vector_store %arg5[%c0_8, %c0_9], %10 {strides = array<i32>} : memref<8x1xf32, #tpu.memory_space<vmem>>, vector<8x1xf32>,
    return
  }
  func.func @transform_0(%arg0: i32) -> (i32, i32) {
    %c0_i32 = arith.constant 0 : i32
    %c0_i32_0 = arith.constant 0 : i32
    return %arg0, %c0_i32 : i32, i32
  }
  func.func @transform_1(%arg0: i32) -> (i32, i32) {
    %c0_i32 = arith.constant 0 : i32
    %c0_i32_0 = arith.constant 0 : i32
    %c0_i32_1 = arith.constant 0 : i32
    return %c0_i32, %c0_i32_0 : i32, i32
  }
  func.func @transform_2(%arg0: i32) -> (i32, i32) {
    %c0_i32 = arith.constant 0 : i32
    %c0_i32_0 = arith.constant 0 : i32
    %c0_i32_1 = arith.constant 0 : i32
    return %c0_i32, %c0_i32_0 : i32, i32
  }
  func.func @transform_3(%arg0: i32) -> (i32, i32) {
    %c0_i32 = arith.constant 0 : i32
    %c0_i32_0 = arith.constant 0 : i32
    return %arg0, %c0_i32 : i32, i32
  }
  func.func @transform_4(%arg0: i32) -> (i32, i32) {
    %c0_i32 = arith.constant 0 : i32
    %c0_i32_0 = arith.constant 0 : i32
    return %arg0, %c0_i32 : i32, i32
  }
}

</mosaic_0001>

<bundles_post_ra>
// kernel: tpu_custom_call.1
= control target key start
LH: loop header
LB: loop body
LE: loop exit
PB: predicated region body
PF: predicated region fallthrough
CT: control target
= control target key end

     0   :  { %s1271_s0 = inlined_call_operand.vmem [shape: f32[16,32], index: 0, kind: input, shape index: {}]   ;;  %s1272_s1 = inlined_call_operand.vmem [shape: f32[32,1], index: 1, kind: input, shape index: {}]   ;;  %s1273_s2 = inlined_call_operand.<no memory space> [shape: f32[1,1], index: 2, kind: input, shape index: {}]   ;;  %s1274_s3 = inlined_call_operand.hbm [shape: f32[16,32], index: 3, kind: output, shape index: {0}]   ;;  %s1275_s4 = inlined_call_operand.vmem [shape: f32[16,1], index: 4, kind: output, shape index: {1}]  }
   0x1   :  { %10 = sst [smem:[#allocation2]] %s1273_s2 }
   0x2   :  { %11 = vsyncpa [#allocation4], 0 }
   0x3   :  { %13 = vsyncpa [#allocation4 + $0x1], 0  ;;  %s1119_s17 = smov 0   ;;  %s1121_s18 = smov 0  }
   0x4   :  { %s1123_s19 = smov 0   ;;  %s1125_s20 = smov 0  }
   0x5 LB: > { %s1140_s2 = sadd.s32 4294967295, %s1084_s20   ;;  %s820_s21 = sadd.s32 4294967294, %s1084_s20   ;;  %s1084_s20 = sphi %s1125_s20, %s1281_s20   ;;  %s1080_s19 = sphi %s1123_s19, %s1280_s19   ;;  %s1076_s18 = sphi %s1121_s18, %s1279_s18   ;;  %s1072_s17 = sphi %s1119_s17, %s1278_s17  }
   0x6   : > { %s1144_s22 = sadd.s32 1, %s1084_s20   ;;  %s94_s23 = sadd.s32 1, %s1080_s19 }
   0x7   : > { %s91_s24 = ssub.s32 %s1084_s20, %s1144_s22  ;;  %p104_p0 = scmp.ne.s32.totalorder %s1080_s19, %s1076_s18 }
   0x8   : > { %p92_p1 = scmp.eq.s32.totalorder %s91_s24, 0  ;;  %p105_p2 = scmp.eq.s32.totalorder %s1140_s2, 1 }
   0x9   : > { %p110_p3 = scmp.ne.s32.totalorder %s1076_s18, %s1072_s17  ;;  %p111_p4 = scmp.eq.s32.totalorder %s820_s21, 1 }
   0xa   : > { %s1155_s25 = scalar_select %p92_p1, %s1080_s19, %s94_s23  }
   0xb   : > { %p1157_p5 = por %p105_p2, %p104_p0  ;;  %p1161_p6 = por %p111_p4, %p110_p3 }
   0xc   : > { %p823_p7 = scmp.ge.s32.totalorder %s1084_s20, 1  ;;  %p168_p8 = scmp.lt.s32.totalorder %s1084_s20, 3 }
   0xe   : > { %p169_p9 = pnand %p823_p7, %p168_p8 }
   0xf   : > { %v206_v0 = vld [vmem:[%s1272_s1] sm:$0xff] (!%p169_p9)  ;;  %v207_v1 = vld [vmem:[%s1272_s1 + $0x8] sm:$0xff] (!%p169_p9)  ;;  %v208_v2 = vld [vmem:[%s1272_s1 + $0x10] sm:$0xff] (!%p169_p9)  ;;  %v1086_v3 = vmov (!%p169_p9), 0.0|0.0   ;;  %p197_p10 = scmp.lt.s32.totalorder (!%p169_p9), %s1140_s2, 1  ;;  %vm1087_vm0 = vmmov (!%p169_p9), 0  }
  0x10   : > { %172 = sbr.rel (%p169_p9) target bundleno = 441 (0x1b9), region = 32  ;;  %946 = vmatprep.subr.bf16.mxu0 (!%p169_p9), %v1086_v3  ;;  %v217_v4 = vand.u32 (!%p169_p9), 4294901760, %v206_v0  ;;  %v220_v5 = vand.u32 (!%p169_p9), 4294901760, %v207_v1  ;;  %928 = vmatprep.subr.bf16.mxu1 (!%p169_p9), %v1086_v3  ;;  %v209_v6 = vld [vmem:[%s1272_s1 + $0x18] sm:$0xff] (!%p169_p9)  ;;  %v223_v7 = vand.u32 (!%p169_p9), 4294901760, %v208_v2  ;;  %v1088_v9 = vmov (!%p169_p9), 0.0  }
  0x11   : > { %v226_v8 = vand.u32 (!%p169_p9), 4294901760, %v209_v6  ;;  %903 = vmatprep.mubr.msk.f32.mxu0 (!%p169_p9), %vm1087_vm0, %v1088_v9  ;;  %870 = vmatprep.mubr.msk.f32.mxu1 (!%p169_p9), %vm1087_vm0, %v1088_v9  ;;  %vm212_vm1 = vcmask (!%p169_p9), 261120   ;;  %v1089_v41 = vmov (!%p169_p9), 0   ;;  %s210_s15 = sld [smem:[#allocation2]] (!%p169_p9)  ;;  %vm714_vm2 = vcmask (!%p169_p9), 7168   ;;  %s188_s24 = sand.u32 (!%p169_p9), 1, %s1076_s18  }
  0x12   : > { %v929_v10 = vpack.c.bf16 (!%p169_p9), %v220_v5, %v217_v4  ;;  %v297_v11 = vsub.f32 (!%p169_p9), %v206_v0, %v217_v4  ;;  %v304_v12 = vsub.f32 (!%p169_p9), %v207_v1, %v220_v5  ;;  %v311_v13 = vsub.f32 (!%p169_p9), %v208_v2, %v223_v7  ;;  %1017 = vset.pattern.permute.xlu0 (!%p169_p9), %v1089_v41  ;;  %s824_s28 = sshll.u32 (!%p169_p9), %s188_s24, 3  ;;  %s829_s29 = sshll.u32 (!%p169_p9), %s1140_s2, 7 }
  0x13   : > { %v318_v14 = vsub.f32 (!%p169_p9), %v209_v6, %v226_v8  ;;  %v932_v15 = vpack.c.bf16 (!%p169_p9), %v226_v8, %v223_v7  ;;  %s190_s30 = scalar_lea.vmem (!%p169_p9), [#allocation3], %s824_s28  ;;  %s1228_s8 = scalar_lea.hbm (!%p169_p9), %s1274_s3, %s829_s29 }
  0x14   : > { %948 = vmatpush3.bf16.msra.mxu0 (!%p169_p9), %v929_v10  ;;  %930 = vmatpush3.bf16.msra.mxu1 (!%p169_p9), %v929_v10  ;;  %v298_v16 = vand.u32 (!%p169_p9), 4294901760, %v297_v11  ;;  %v305_v17 = vand.u32 (!%p169_p9), 4294901760, %v304_v12  ;;  %v312_v19 = vand.u32 (!%p169_p9), 4294901760, %v311_v13  ;;  %v941_v39 = vpack.c.bf16 (!%p169_p9), %v304_v12, %v297_v11  ;;  %s734_s5 = sshll.u32 (!%p169_p9), %s190_s30, 4  ;;  %s717_s9 = scalar_lea.sflag (!%p169_p9), [#allocation4], %s188_s24  ;;  %s1230_s5 = int_to_ptr.vmem [resolvable:$true] %s734_s5 }
  0x15   : > { %949 = vmatprep.subr.bf16.mxu0 (!%p169_p9), %v1086_v3  ;;  %931 = vmatprep.subr.bf16.mxu1 (!%p169_p9), %v1086_v3  ;;  %v319_v23 = vand.u32 (!%p169_p9), 4294901760, %v318_v14  ;;  %v944_v40 = vpack.c.bf16 (!%p169_p9), %v318_v14, %v311_v13 }
  0x16   : > { %v299_v21 = vsub.f32 (!%p169_p9), %v297_v11, %v298_v16  ;;  %v306_v22 = vsub.f32 (!%p169_p9), %v304_v12, %v305_v17  ;;  %v953_v26 = vpack.c.bf16 (!%p169_p9), %v305_v17, %v298_v16  ;;  %v313_v29 = vsub.f32 (!%p169_p9), %v311_v13, %v312_v19 }
  0x17   : > { %s1187_s10 = scalar_select %p197_p10, %s1140_s2, 1  ;;  %v320_v30 = vsub.f32 %v318_v14, %v319_v23  ;;  %v956_v34 = vpack.c.bf16 %v319_v23, %v312_v19  ;;  %v211_v44 = vstv %s210_s15 }
  0x18   : > { %951 = vmatpush3.bf16.msra.mxu0 %v932_v15  ;;  %933 = vmatpush3.bf16.msra.mxu1 %v932_v15  ;;  %v300_v27 = vand.u32 4294901760, %v299_v21  ;;  %v307_v28 = vand.u32 4294901760, %v306_v22  ;;  %v314_v35 = vand.u32 4294901760, %v313_v29  ;;  %s1090_s2 = smov [#allocation3]  }
  0x19   : > { %s825_s11 = sshll.u32 %s1187_s10, 3  ;;  %952 = vmatprep.subr.bf16.mxu0 %v1086_v3  ;;  %934 = vmatprep.subr.bf16.mxu1 %v1086_v3  ;;  %v321_v36 = vand.u32 4294901760, %v320_v30  ;;  %s1022_s10 = scalar_lea.vmem %s1230_s5, 128 }
  0x1a   : > { %s200_s14 = scalar_lea.vmem %s1271_s0, %s825_s11  ;;  %v935_v33 = vpack.c.bf16 %v307_v28, %v300_v27  ;;  %s204_s23 = scalar_lea.vmem %s1275_s4, %s825_s11 }
  0x1b   : > { %v1197_v18 = vld [vmem:[%s200_s14] sm:$0xff]  ;;  %v938_v38 = vpack.c.bf16 %v321_v36, %v314_v35  ;;  %p1023_p11 = scmp.ne.s32.totalorder %s1230_s5, %s1022_s10  ;;  %s1026_s11 = sshll.u32 %s1090_s2, 4  ;;  %s1027_s11 = int_to_ptr.vmem [resolvable:$false] %s1026_s11 }
  0x1c   : > { %v214_v20 = vsel %vm212_vm1, %v1197_v18, 0  ;;  %s1028_s12 = scalar_lea.vmem %s1027_s11, 256  ;;  %p1029_p0 = scmp.lt.s32.totalorder %s1230_s5, %s1027_s11 }
  0x1d   : > { %v285_v24 = vand.u32 4294901760, %v214_v20  ;;  %p1024_p12 = pnand %p1023_p11, %p1157_p5  ;;  %p1030_p1 = scmp.lt.s32.totalorder %s1028_s12, %s1022_s10 }
  0x1f   : > { %v286_v25 = vsub.f32 %v214_v20, %v285_v24  ;;  %p1025_p13 = pneg %p1024_p12  ;;  %p1031_p2 = por %p1030_p1, %p1029_p0 }
  0x21   : > { %v287_v31 = vand.u32 4294901760, %v286_v25  ;;  %p1032_p3 = pnand %p1031_p2, %p1025_p13 }
  0x23   : > { %904 = vmatmul.mubr.f32.vlgmr.msra.gmra.mrb[0].mxu0 %v287_v31  ;;  %v288_v32 = vsub.f32 %v286_v25, %v287_v31 }
  0x24   : > { %954 = vmatpush3.bf16.msra.mxu0 %v953_v26  ;;  %914 = vmatprep.mubr.msk.f32.mxu0 %vm1087_vm0, %v1088_v9 }
  0x25   : > { %v289_v37 = vand.u32 4294901760, %v288_v32  ;;  %955 = vmatprep.subr.bf16.mxu0 %v1086_v3 }
  0x27   : > { %871 = vmatmul.mubr.f32.vlgmr.msra.gmra.mrb[0].mxu1 %v289_v37 }
  0x28   : > { %936 = vmatpush3.bf16.msra.mxu1 %v935_v33  ;;  %957 = vmatpush3.bf16.msra.mxu0 %v956_v34 }
  0x29   : > { %937 = vmatprep.subr.bf16.mxu1 %v1086_v3  ;;  %958 = vmatprep.subr.bf16.mxu0 %v1086_v3 }
  0x2a   : > { %881 = vmatprep.mubr.msk.f32.mxu1 %vm1087_vm0, %v1088_v9 }
  0x2b   : > { %915 = vmatmul.mubr.f32.vlgmr.msra.gmra.mrb[0].mxu0 %v285_v24 }
  0x2c   : > { %939 = vmatpush3.bf16.msra.mxu1 %v938_v38  ;;  %960 = vmatpush3.bf16.msra.mxu0 %v929_v10 }
  0x2d   : > { %940 = vmatprep.subr.bf16.mxu1 %v1086_v3  ;;  %961 = vmatprep.subr.bf16.mxu0 %v1086_v3 }
  0x2e   : > { %925 = vmatprep.mubr.msk.f32.mxu0 %vm1087_vm0, %v1088_v9 }
  0x2f   : > { %882 = vmatmul.mubr.f32.vlgmr.msra.gmra.mrb[0].mxu1 %v285_v24 }
  0x30   : > { %942 = vmatpush3.bf16.msra.mxu1 %v941_v39  ;;  %963 = vmatpush3.bf16.msra.mxu0 %v932_v15 }
  0x31   : > { %943 = vmatprep.subr.bf16.mxu1 %v1086_v3  ;;  %892 = vmatprep.mubr.msk.f32.mxu1 %vm1087_vm0, %v1088_v9 }
  0x33   : > { %926 = vmatmul.mubr.f32.vlgmr.msra.gmra.mrb[0].mxu0 %v285_v24 }
  0x34   : > { %945 = vmatpush3.bf16.msra.mxu1 %v944_v40 }
  0x37   : > { %893 = vmatmul.mubr.f32.vlgmr.msra.gmra.mrb[0].mxu1 %v286_v25 }
 0x106   : > { %v697_v42 = vpop.f32.mrb[0].mxu0 }
 0x107   : > { %v927_v43 = vpop.f32.mrb[1].mxu0 }
 0x10a   : > { %v462_v45 = vpop.f32.mrb[0].mxu1 }
 0x10b   : > { %v964_v46 = vadd.f32 %v462_v45, %v211_v44  ;;  %v894_v47 = vpop.f32.mrb[1].mxu1 }
 0x10d   : > { %v965_v48 = vadd.f32 %v964_v46, %v697_v42 }
 0x10f   : > { %v827_v49 = vmul.f32 -1.442695, %v965_v48 }
 0x111   : > { %1018 = vpow2.f32 %v827_v49 }
 0x11b   : > { %v1019_v50 = vpop.eup %1018 }
 0x11c   : > { %v704_v51 = vadd.f32 1.0, %v1019_v50 }
 0x11e   : > { %1020 = vrcp.f32 %v704_v51 }
 0x128   : > { %v1021_v52 = vpop.eup %1020 }
 0x129   : > { %715 = vst.msk [vmem:[%s204_s23] sm:$0xff] %vm714_vm2, %v1021_v52  ;;  %709 = vperm.xlu0 %1017, %v1021_v52  }
 0x1a8   : > { %v710_v53 = vpop.permute.xlu0 %709 }
 0x1a9   : > { %v712_v54 = vmul.f32 %v710_v53, %v1197_v18 }
 0x1ab   : > { %713 = vst.msk [vmem:[%s190_s30] sm:$0xff] %vm212_vm1, %v712_v54 }
 0x1ac   : > { %1035 = shalt.err (!%p1032_p3)
}
 0x1ad   : > { %s1036_s13 = scalar_lea.hbm %s1228_s8, 128  ;;  %s1040_s16 = scalar_lea.hbm %s1274_s3, 256 }
 0x1ae   : > { %p1037_p4 = scmp.ne.s32.totalorder %s1228_s8, %s1036_s13  ;;  %p1041_p9 = scmp.lt.u32.totalorder %s1228_s8, %s1274_s3 }
 0x1af   : > { %p1042_p10 = scmp.lt.u32.totalorder %s1040_s16, %s1036_s13  ;;  %p1044_p12 = scmp.lt.u32.totalorder %s1036_s13, %s1228_s8 }
 0x1b0   : > { %p1038_p7 = pnand %p1037_p4, %p1157_p5 }
 0x1b1   : > { %p1043_p11 = por %p1042_p10, %p1041_p9 }
 0x1b2   : > { %p1039_p8 = pneg %p1038_p7 }
 0x1b3   : > { %p1045_p13 = por %p1044_p12, %p1043_p11 }
 0x1b5   : > { %p1046_p0 = pnand %p1045_p13, %p1039_p8 }
 0x1b7   : > { %1049 = shalt.err (!%p1046_p0)
}
 0x1b8   : > { %974 = dma.vmem_to_hbm [thread:$0]  (%p1157_p5), %s1230_s5, 128, %s1228_s8, %s717_s9  }
 0x1b9 PF: > { %p980_p1 = scmp.ge.s32.totalorder %s1084_s20, 2  ;;  %s749_s24 = sand.u32 1, %s1072_s17  }
 0x1ba   : > { %s750_s28 = scalar_lea.sflag [#allocation4], %s749_s24 }
 0x1bb   : > { %p977_p2 = pnand %p980_p1, %p1161_p6 }
 0x1bd   : > { %1067 = dma.done.wait (!%p977_p2), %s750_s28, 128  }
 0x1be   : > { %1069 = vsyncadd (!%p977_p2), %s750_s28, 4294967168  ;;  %p16_p3 = scmp.ge.s32.totalorder %s1144_s22, 4   ;;  %s1278_s17 = smov %s1076_s18 }
 0x1bf   : > { %s1279_s18 = smov %s1080_s19  ;;  %s1280_s19 = smov %s1155_s25 }
 0x1c0   : > { %s1281_s20 = smov %s1144_s22  ;;  %18 = sbr.rel (!%p16_p3) target bundleno = 5 (0x5), region = 79 }
 0x1c7   :  { %762 = vsyncpa [#allocation4], 1 }
 0x1c8   :  { %764 = vsyncpa [#allocation4 + $0x1], 1 }

</bundles_post_ra>
